<compile_context>
chip_gen: v6e
topology: v6e:2x2x1
jax: 0.10.0
libtpu: 0.0.40
codegen_flags: <defaults>
</compile_context>

<pallas_src>
import math
import jax
import jax.numpy as jnp
from jax.experimental import pallas as pl
from jax.experimental.pallas import tpu as pltpu

LANE = 128
SUBLANE = 8


def _round_up(x, m):
    return ((x + m - 1) // m) * m


def _cdiv(a, b):
    return -(-a // b)


# ----------------------------- Pallas kernel --------------------------------

def _make_snn_kernel(num_layers: int, pe_reps: int):
    """Fused: h = relu-stack(x + pe); out1 = h; out2 = h @ Wheads + bheads (all heads fused)."""

    def kernel(*refs):
        # ref order:
        #   x, pe, (w_i, b_i) * num_layers, wh, bh, out1, out2
        idx = 0
        x_ref = refs[idx]; idx += 1
        pe_ref = refs[idx]; idx += 1
        layer_refs = []
        for _ in range(num_layers):
            layer_refs.append((refs[idx], refs[idx + 1])); idx += 2
        wh_ref = refs[idx]; bh_ref = refs[idx + 1]; idx += 2
        out1_ref = refs[idx]; out2_ref = refs[idx + 1]

        # PositionalEncoding.forward: x + pe (dropout is identity at inference).
        pe = pe_ref[...]
        if pe_reps > 1:
            # Row tile is a multiple of seq_len, so the (S, Dp) PE block tiles it exactly.
            pe = jnp.concatenate([pe] * pe_reps, axis=0)
        h = x_ref[...] + pe  # float32

        # linear_relu_stack: (Linear -> ReLU) * layers; trailing Dropout is identity.
        # bf16 operands, f32 accumulation on the MXU.
        for (w_ref, b_ref) in layer_refs:
            h = jnp.dot(h.astype(jnp.bfloat16), w_ref[...],
                        preferred_element_type=jnp.float32) + b_ref[...]
            h = jnp.maximum(h, 0.0)

        out1_ref[...] = h.astype(out1_ref.dtype)

        # All task heads fused into a single lane-dense matmul.
        out2_ref[...] = (
            jnp.dot(h.astype(jnp.bfloat16), wh_ref[...],
                    preferred_element_type=jnp.float32) + bh_ref[...]
        ).astype(out2_ref.dtype)

    return kernel


# ------------------------------ Wrapper --------------------------------------

def simple_nn_forward_pallas(x_emb, pe_slice, layer_params, head_params, *, target_tm=256):
    """x_emb: (B, S, D) f32 embedded tokens; pe_slice: (S, D) f32 PE rows.

    layer_params: list of (W:(in,out), b:(1,out)) f32 for the Linear+ReLU stack.
    head_params:  list of (Wh:(hidden,nc), bh:(1,nc)) f32 for the task heads.
    Returns (out1:(B,S,hidden), [head_out_j:(B,S,nc_j)]), all float32.
    """
    B, S, D = x_emb.shape
    N = B * S
    hidden = layer_params[-1][0].shape[1]
    head_ncs = [w.shape[1] for (w, _) in head_params]
    sum_nc = sum(head_ncs)

    Dp = _round_up(D, LANE)
    Hp = _round_up(hidden, LANE)
    Cp = _round_up(sum_nc, LANE)

    # Row tile: multiple of the sublane count AND of seq_len (so the resident PE block
    # tiles each row block exactly). Target ~256 rows/step, single step for tiny N.
    base = (S * SUBLANE) // math.gcd(S, SUBLANE)
    tm = base * max(1, min(_cdiv(N, base), max(1, target_tm // base)))
    Np = _round_up(N, tm)

    # ---- lane-dense padding of activations / PE (cheap host-side glue) ----
    x = x_emb.reshape(N, D).astype(jnp.float32)
    x = jnp.pad(x, ((0, Np - N), (0, Dp - D)))
    pe = jnp.pad(pe_slice.astype(jnp.float32), ((0, 0), (0, Dp - D)))

    # ---- pad + bf16-cast weights; fuse all task heads into one weight matrix ----
    padded_layers = []
    for (w, b) in layer_params:
        di, do = w.shape
        dip, dop = _round_up(di, LANE), _round_up(do, LANE)
        wp = jnp.pad(w, ((0, dip - di), (0, dop - do))).astype(jnp.bfloat16)
        bp = jnp.pad(b, ((0, 0), (0, dop - do))).astype(jnp.float32)
        padded_layers.append((wp, bp))

    wh = jnp.concatenate([w for (w, _) in head_params], axis=1)
    bh = jnp.concatenate([b for (_, b) in head_params], axis=1)
    wh = jnp.pad(wh, ((0, Hp - hidden), (0, Cp - sum_nc))).astype(jnp.bfloat16)
    bh = jnp.pad(bh, ((0, 0), (0, Cp - sum_nc))).astype(jnp.float32)

    grid = (Np // tm,)

    in_specs = [
        pl.BlockSpec((tm, Dp), lambda i: (i, 0)),   # activation row tile
        pl.BlockSpec((S, Dp), lambda i: (0, 0)),    # PE rows, fully resident
    ]
    args = [x, pe]
    for (wp, bp) in padded_layers:
        in_specs.append(pl.BlockSpec(wp.shape, lambda i: (0, 0)))  # resident weight
        in_specs.append(pl.BlockSpec(bp.shape, lambda i: (0, 0)))  # resident bias
        args += [wp, bp]
    in_specs.append(pl.BlockSpec(wh.shape, lambda i: (0, 0)))      # fused head weight
    in_specs.append(pl.BlockSpec(bh.shape, lambda i: (0, 0)))      # fused head bias
    args += [wh, bh]

    out_shapes = (jax.ShapeDtypeStruct((Np, Hp), jnp.float32),
                  jax.ShapeDtypeStruct((Np, Cp), jnp.float32))
    out_specs = (pl.BlockSpec((tm, Hp), lambda i: (i, 0)),
                 pl.BlockSpec((tm, Cp), lambda i: (i, 0)))

    kernel = _make_snn_kernel(len(layer_params), tm // S)
    out1_p, out2_p = pl.pallas_call(
        kernel,
        out_shape=out_shapes,
        grid=grid,
        in_specs=in_specs,
        out_specs=out_specs,
        compiler_params=pltpu.CompilerParams(dimension_semantics=("parallel",)),
    )(*args)

    out1 = out1_p[:N, :hidden].reshape(B, S, hidden)
    head_outs = []
    off = 0
    for nc in head_ncs:
        head_outs.append(out2_p[:N, off:off + nc].reshape(B, S, nc))
        off += nc
    return out1, head_outs


# --------------------------- Parameter construction --------------------------

def make_positional_encoding(max_len, d_model):
    """Same formula as the PyTorch PositionalEncoding buffer."""
    position = jnp.arange(max_len, dtype=jnp.float32)[:, None]
    div_term = jnp.exp(jnp.arange(0, d_model, 2, dtype=jnp.float32)
                       * (-math.log(10000.0) / d_model))
    pe = jnp.zeros((max_len, d_model), dtype=jnp.float32)
    pe = pe.at[:, 0::2].set(jnp.sin(position * div_term))
    pe = pe.at[:, 1::2].set(jnp.cos(position * div_term))
    return pe


def init_params(key, vocab_size, pad_token_id, emb_dim, hidden_dim, layers, head_classes):
    keys = jax.random.split(key, 2 + 2 * layers + 2 * len(head_classes))
    ki = iter(range(len(keys)))

    # nn.Embedding(vocab, emb_dim, padding_idx=pad) -> zero the padding row
    emb_w = jax.random.normal(keys[next(ki)], (vocab_size, emb_dim), jnp.float32) * 0.02
    emb_w = emb_w.at[pad_token_id].set(0.0)

    layer_params = []
    in_dim = emb_dim
    for _ in range(layers):
        w = jax.random.normal(keys[next(ki)], (in_dim, hidden_dim), jnp.float32) * (1.0 / math.sqrt(in_dim))
        b = jax.random.normal(keys[next(ki)], (1, hidden_dim), jnp.float32) * 0.01
        layer_params.append((w, b))
        in_dim = hidden_dim

    head_params = []
    for nclasses in head_classes.values():
        w = jax.random.normal(keys[next(ki)], (hidden_dim, nclasses), jnp.float32) * (1.0 / math.sqrt(hidden_dim))
        b = jax.random.normal(keys[next(ki)], (1, nclasses), jnp.float32) * 0.01
        head_params.append((w, b))

    return emb_w, layer_params, head_params


# ---------------------------- Reference (pure JAX, f32) -----------------------

def reference_forward(input_ids, emb_w, pe_table, layer_params, head_params, head_names):
    B, S = input_ids.shape
    x = emb_w[input_ids]                                  # (B, S, D)
    x = x + pe_table[:S, :][None, :, :]                   # PositionalEncoding (eval)
    h = x
    for (w, b) in layer_params:
        h = jnp.maximum(h @ w + b, 0.0)                   # Linear + ReLU
    out1 = h                                              # Dropout identity in eval
    out2 = {name: out1 @ w + b for name, (w, b) in zip(head_names, head_params)}
    return out1, out2


# ----------------------------------- main ------------------------------------

if __name__ == "__main__":
    # Small, module-consistent configuration.
    B, S = 2, 8                  # batch, seq_len
    vocab_size = 128
    pad_token_id = 0
    emb_dim = 32                 # config['STUDENT']['emb_dim']
    hidden_dim = 64              # config['STUDENT']['output_dim']
    layers = 1                   # config['STUDENT']['layers']
    pe_type = "absolute_sin"     # config['STUDENT']['pe_type']
    head_classes = {"classification": 8, "multilabel": 4}   # teacher task heads
    head_names = list(head_classes.keys())

    key = jax.random.PRNGKey(0)
    k_param, k_ids = jax.random.split(key)

    emb_w, layer_params, head_params = init_params(
        k_param, vocab_size, pad_token_id, emb_dim, hidden_dim, layers, head_classes
    )
    pe_table = make_positional_encoding(max_len=5000, d_model=emb_dim)

    input_ids = jax.random.randint(k_ids, (B, S), 0, vocab_size, dtype=jnp.int32)

    # ----- glue: embedding gather (table lookup stays in XLA) -----
    x_emb = emb_w[input_ids]                                             # (B, S, D)
    if pe_type == "absolute_sin":
        pe_slice = pe_table[:S, :]                                       # (S, D)
    else:
        pe_slice = jnp.zeros((S, emb_dim), jnp.float32)

    # ----- fused Pallas kernel: PE add + Linear/ReLU stack + fused task heads -----
    out1, head_outs = simple_nn_forward_pallas(
        x_emb, pe_slice, layer_params, head_params, target_tm=256
    )
    out2 = {name: o for name, o in zip(head_names, head_outs)}

    jax.block_until_ready(out1)
    for v in out2.values():
        jax.block_until_ready(v)

    # ----- correctness check against pure-JAX f32 reference -----
    # (kernel uses bf16 MXU operands with f32 accumulation -> relaxed tolerance)
    ref_out1, ref_out2 = reference_forward(
        input_ids, emb_w, pe_table, layer_params, head_params, head_names
    )
    assert out1.shape == ref_out1.shape
    assert jnp.allclose(out1, ref_out1, atol=5e-2, rtol=5e-2)
    for name in head_names:
        assert out2[name].shape == ref_out2[name].shape
        assert jnp.allclose(out2[name], ref_out2[name], atol=5e-2, rtol=5e-2)

    print("KERNEL_OK")
</pallas_src>

<mosaic_0001>
module attributes {stable_mosaic.version = 11 : i64} {
  func.func @kernel(%arg0: i32, %arg1: memref<16x128xf32, #tpu.memory_space<vmem>>, %arg2: memref<8x128xf32, #tpu.memory_space<vmem>>, %arg3: memref<128x128xbf16, #tpu.memory_space<vmem>>, %arg4: memref<1x128xf32, #tpu.memory_space<vmem>>, %arg5: memref<128x128xbf16, #tpu.memory_space<vmem>>, %arg6: memref<1x128xf32, #tpu.memory_space<vmem>>, %arg7: memref<16x128xf32, #tpu.memory_space<vmem>>, %arg8: memref<16x128xf32, #tpu.memory_space<vmem>>) attributes {dimension_semantics = [#tpu.dimension_semantics<parallel>], iteration_bounds = array<i64: 1>, scalar_prefetch = 0 : i64, scratch_operands = 0 : i64, tpu.core_type = #tpu.core_type<tc>, window_params = [{transform_indices = @transform_0, window_bounds = array<i64: 16, 128>}, {pipeline_mode = #tpu.pipeline_mode<synchronous>, transform_indices = @transform_1, window_bounds = array<i64: 8, 128>}, {pipeline_mode = #tpu.pipeline_mode<synchronous>, transform_indices = @transform_2, window_bounds = array<i64: 128, 128>}, {pipeline_mode = #tpu.pipeline_mode<synchronous>, transform_indices = @transform_3, window_bounds = array<i64: 1, 128>}, {pipeline_mode = #tpu.pipeline_mode<synchronous>, transform_indices = @transform_4, window_bounds = array<i64: 128, 128>}, {pipeline_mode = #tpu.pipeline_mode<synchronous>, transform_indices = @transform_5, window_bounds = array<i64: 1, 128>}, {transform_indices = @transform_6, window_bounds = array<i64: 16, 128>}, {transform_indices = @transform_7, window_bounds = array<i64: 16, 128>}]} {
    %c0 = arith.constant 0 : index
    %c0_0 = arith.constant 0 : index
    %0 = vector.load %arg2[%c0, %c0_0] : memref<8x128xf32, #tpu.memory_space<vmem>>, vector<8x128xf32>
    %1 = tpu.concatenate %0, %0 in 0 : vector<8x128xf32>, vector<8x128xf32> -> vector<16x128xf32>
    %c0_1 = arith.constant 0 : index
    %c0_2 = arith.constant 0 : index
    %2 = vector.load %arg1[%c0_1, %c0_2] : memref<16x128xf32, #tpu.memory_space<vmem>>, vector<16x128xf32>
    %3 = arith.addf %2, %1 : vector<16x128xf32>
    %4 = arith.truncf %3 : vector<16x128xf32> to vector<16x128xbf16>
    %c0_3 = arith.constant 0 : index
    %c0_4 = arith.constant 0 : index
    %5 = vector.load %arg3[%c0_3, %c0_4] : memref<128x128xbf16, #tpu.memory_space<vmem>>, vector<128x128xbf16>
    %cst = arith.constant dense<0.000000e+00> : vector<16x128xf32>
    %6 = tpu.matmul %4, %5, %cst {dimension_numbers = #tpu.dot_dimension_numbers<[1], [0], [0], [1], [0, 0, 1, 1], [], []>} : vector<16x128xbf16>, vector<128x128xbf16>, vector<16x128xf32> -> vector<16x128xf32>
    %c0_5 = arith.constant 0 : index
    %c0_6 = arith.constant 0 : index
    %7 = vector.load %arg4[%c0_5, %c0_6] : memref<1x128xf32, #tpu.memory_space<vmem>>, vector<1x128xf32>
    %8 = vector.broadcast %7 : vector<1x128xf32> to vector<16x128xf32>
    %9 = arith.addf %6, %8 : vector<16x128xf32>
    %cst_7 = arith.constant 0.000000e+00 : f32
    %10 = vector.broadcast %cst_7 : f32 to vector<16x128xf32>
    %11 = arith.maximumf %9, %10 : vector<16x128xf32>
    %c0_8 = arith.constant 0 : index
    %c0_9 = arith.constant 0 : index
    %12 = vector.load %arg7[%c0_8, %c0_9] : memref<16x128xf32, #tpu.memory_space<vmem>>, vector<16x128xf32>
    tpu.vector_store %arg7[%c0_8, %c0_9], %11 {strides = array<i32>} : memref<16x128xf32, #tpu.memory_space<vmem>>, vector<16x128xf32>,
    %13 = arith.truncf %11 : vector<16x128xf32> to vector<16x128xbf16>
    %c0_10 = arith.constant 0 : index
    %c0_11 = arith.constant 0 : index
    %14 = vector.load %arg5[%c0_10, %c0_11] : memref<128x128xbf16, #tpu.memory_space<vmem>>, vector<128x128xbf16>
    %cst_12 = arith.constant dense<0.000000e+00> : vector<16x128xf32>
    %15 = tpu.matmul %13, %14, %cst_12 {dimension_numbers = #tpu.dot_dimension_numbers<[1], [0], [0], [1], [0, 0, 1, 1], [], []>} : vector<16x128xbf16>, vector<128x128xbf16>, vector<16x128xf32> -> vector<16x128xf32>
    %c0_13 = arith.constant 0 : index
    %c0_14 = arith.constant 0 : index
    %16 = vector.load %arg6[%c0_13, %c0_14] : memref<1x128xf32, #tpu.memory_space<vmem>>, vector<1x128xf32>
    %17 = vector.broadcast %16 : vector<1x128xf32> to vector<16x128xf32>
    %18 = arith.addf %15, %17 : vector<16x128xf32>
    %c0_15 = arith.constant 0 : index
    %c0_16 = arith.constant 0 : index
    %19 = vector.load %arg8[%c0_15, %c0_16] : memref<16x128xf32, #tpu.memory_space<vmem>>, vector<16x128xf32>
    tpu.vector_store %arg8[%c0_15, %c0_16], %18 {strides = array<i32>} : memref<16x128xf32, #tpu.memory_space<vmem>>, vector<16x128xf32>,
    return
  }
  func.func @transform_0(%arg0: i32) -> (i32, i32) {
    %c0_i32 = arith.constant 0 : i32
    %c0_i32_0 = arith.constant 0 : i32
    return %arg0, %c0_i32 : i32, i32
  }
  func.func @transform_1(%arg0: i32) -> (i32, i32) {
    %c0_i32 = arith.constant 0 : i32
    %c0_i32_0 = arith.constant 0 : i32
    %c0_i32_1 = arith.constant 0 : i32
    return %c0_i32, %c0_i32_0 : i32, i32
  }
  func.func @transform_2(%arg0: i32) -> (i32, i32) {
    %c0_i32 = arith.constant 0 : i32
    %c0_i32_0 = arith.constant 0 : i32
    %c0_i32_1 = arith.constant 0 : i32
    return %c0_i32, %c0_i32_0 : i32, i32
  }
  func.func @transform_3(%arg0: i32) -> (i32, i32) {
    %c0_i32 = arith.constant 0 : i32
    %c0_i32_0 = arith.constant 0 : i32
    %c0_i32_1 = arith.constant 0 : i32
    return %c0_i32, %c0_i32_0 : i32, i32
  }
  func.func @transform_4(%arg0: i32) -> (i32, i32) {
    %c0_i32 = arith.constant 0 : i32
    %c0_i32_0 = arith.constant 0 : i32
    %c0_i32_1 = arith.constant 0 : i32
    return %c0_i32, %c0_i32_0 : i32, i32
  }
  func.func @transform_5(%arg0: i32) -> (i32, i32) {
    %c0_i32 = arith.constant 0 : i32
    %c0_i32_0 = arith.constant 0 : i32
    %c0_i32_1 = arith.constant 0 : i32
    return %c0_i32, %c0_i32_0 : i32, i32
  }
  func.func @transform_6(%arg0: i32) -> (i32, i32) {
    %c0_i32 = arith.constant 0 : i32
    %c0_i32_0 = arith.constant 0 : i32
    return %arg0, %c0_i32 : i32, i32
  }
  func.func @transform_7(%arg0: i32) -> (i32, i32) {
    %c0_i32 = arith.constant 0 : i32
    %c0_i32_0 = arith.constant 0 : i32
    return %arg0, %c0_i32 : i32, i32
  }
}

</mosaic_0001>

<bundles_post_ra>
// kernel: tpu_custom_call.1
= control target key start
LH: loop header
LB: loop body
LE: loop exit
PB: predicated region body
PF: predicated region fallthrough
CT: control target
= control target key end

     0   :  { %13 = vsyncpa [#allocation3], 0  ;;  %s672_s0 = inlined_call_operand.hbm [shape: f32[16,128], index: 0, kind: input, shape index: {}]   ;;  %s673_s1 = inlined_call_operand.hbm [shape: f32[8,128], index: 1, kind: input, shape index: {}]   ;;  %s674_s2 = inlined_call_operand.hbm [shape: bf16[128,128], index: 2, kind: input, shape index: {}]   ;;  %s675_s3 = inlined_call_operand.vmem [shape: f32[1,128], index: 3, kind: input, shape index: {}]   ;;  %s676_s4 = inlined_call_operand.hbm [shape: bf16[128,128], index: 4, kind: input, shape index: {}]   ;;  %s677_s5 = inlined_call_operand.vmem [shape: f32[1,128], index: 5, kind: input, shape index: {}]   ;;  %s678_s6 = inlined_call_operand.hbm [shape: f32[16,128], index: 6, kind: output, shape index: {0}]   ;;  %s679_s7 = inlined_call_operand.hbm [shape: f32[16,128], index: 7, kind: output, shape index: {1}]  }
   0x1   :  { %14 = vsyncpa [#allocation6], 0 }
   0x2   :  { %15 = vsyncpa [#allocation9], 0 }
   0x3   :  { %16 = vsyncpa [#allocation4], 0 }
   0x4   :  { %17 = vsyncpa [#allocation12], 0  ;;  %s587_s24 = smov [#allocation5]   ;;  %s588_s26 = smov [#allocation2]  }
   0x5   :  { %s36_s25 = sshll.u32 %s587_s24, 4  ;;  %s23_s27 = sshll.u32 %s588_s26, 4  ;;  %s37_s25 = int_to_ptr.vmem [resolvable:$true] %s36_s25  ;;  %s24_s27 = int_to_ptr.vmem [resolvable:$true] %s23_s27 }
   0x6   :  { %s465_s28 = scalar_lea.vmem %s37_s25, 128  ;;  %p470_p1 = scmp.lt.s32.totalorder %s37_s25, %s37_s25 }
   0x7   :  { %p466_p0 = scmp.ne.s32.totalorder %s37_s25, %s465_s28  ;;  %p471_p2 = scmp.lt.s32.totalorder %s465_s28, %s465_s28 }
   0x9   :  { %p472_p3 = por %p471_p2, %p470_p1 }
   0xb   :  { %p473_p4 = pnand %p472_p3, %p466_p0 }
   0xd   :  { %476 = shalt.err (!%p473_p4)
}
   0xe   :  { %39 = dma.hbm_to_vmem [thread:$0]  %s673_s1, 128, %s37_s25, [#allocation6]  }
   0xf   :  { %s485_s8 = scalar_lea.vmem %s24_s27, 256  ;;  %p490_p6 = scmp.lt.s32.totalorder %s24_s27, %s24_s27 }
  0x10   :  { %p486_p5 = scmp.ne.s32.totalorder %s24_s27, %s485_s8  ;;  %p491_p7 = scmp.lt.s32.totalorder %s485_s8, %s485_s8 }
  0x12   :  { %p492_p8 = por %p491_p7, %p490_p6 }
  0x14   :  { %p493_p9 = pnand %p492_p8, %p486_p5 }
  0x16   :  { %496 = shalt.err (!%p493_p9)
}
  0x17   :  { %s589_s9 = smov 128   ;;  %s590_s10 = smov 8  }
  0x18   :  { %29 = dma.hbm_to_vmem [thread:$0]  %s672_s0, 256, %s24_s27, [#allocation3], %s589_s9, %s589_s9, %s590_s10  }
  0x19   :  { %s591_s13 = smov [#allocation7]  }
  0x1a   :  { %s45_s14 = sshll.u32 %s591_s13, 4  ;;  %s46_s14 = int_to_ptr.vmem [resolvable:$true] %s45_s14 }
  0x1b   :  { %s505_s1 = scalar_lea.vmem %s46_s14, 1024  ;;  %p510_p11 = scmp.lt.s32.totalorder %s46_s14, %s46_s14 }
  0x1c   :  { %p506_p10 = scmp.ne.s32.totalorder %s46_s14, %s505_s1  ;;  %p511_p12 = scmp.lt.s32.totalorder %s505_s1, %s505_s1 }
  0x1e   :  { %p512_p13 = por %p511_p12, %p510_p11 }
  0x20   :  { %p513_p0 = pnand %p512_p13, %p506_p10 }
  0x22   :  { %516 = shalt.err (!%p513_p0)
}
  0x23   :  { %s592_s15 = smov 64   ;;  %s593_s16 = smov 4  }
  0x24   :  { %51 = dma.hbm_to_vmem [thread:$0]  %s674_s2, 1024, %s46_s14, [#allocation6], %s592_s15, %s592_s15, %s593_s16  }
  0x25   :  { %s594_s19 = smov [#allocation8]  }
  0x26   :  { %s59_s20 = sshll.u32 %s594_s19, 4  ;;  %s60_s20 = int_to_ptr.vmem [resolvable:$true] %s59_s20 }
  0x27   :  { %s525_s0 = scalar_lea.vmem %s60_s20, 1024  ;;  %p530_p2 = scmp.lt.s32.totalorder %s60_s20, %s60_s20 }
  0x28   :  { %p526_p1 = scmp.ne.s32.totalorder %s60_s20, %s525_s0  ;;  %p531_p3 = scmp.lt.s32.totalorder %s525_s0, %s525_s0 }
  0x2a   :  { %p532_p4 = por %p531_p3, %p530_p2 }
  0x2c   :  { %p533_p5 = pnand %p532_p4, %p526_p1 }
  0x2e   :  { %536 = shalt.err (!%p533_p5)
}
  0x2f   :  { %65 = dma.hbm_to_vmem [thread:$0]  %s676_s4, 1024, %s60_s20, [#allocation9], %s592_s15, %s592_s15, %s593_s16  }
  0x30   :  { %577 = dma.done.wait [#allocation3], 256  }
  0x31   :  { %578 = vsyncadd [#allocation3], 4294967040 }
  0x32   :  { %579 = dma.done.wait [#allocation6], 1152  }
  0x33   :  { %580 = vsyncadd [#allocation6], 4294966144 }
  0x34   :  { %581 = dma.done.wait [#allocation9], 1024  }
  0x35   :  { %582 = vsyncadd [#allocation9], 4294966272  ;;  %v595_v0 = vmov 0.0   ;;  %vm596_vm0 = vmmov 0   ;;  %v441_v1 = vld [vmem:[#allocation7 + $0x38] sm:$0xff]   ;;  %v442_v2 = vld [vmem:[#allocation7 + $0x30] sm:$0xff]  }
  0x36   :  { %389 = vmatprep.subr.bf16.mxu0 %v595_v0  ;;  %405 = vmatprep.mubr.msk.bf16.mxu0 %vm596_vm0, %v595_v0  ;;  %v443_v3 = vld [vmem:[#allocation7 + $0x28] sm:$0xff]   ;;  %v449_v4 = vld [vmem:[#allocation8 + $0x38] sm:$0xff]   ;;  %v444_v5 = vld [vmem:[#allocation7 + $0x20] sm:$0xff]   ;;  %s597_s23 = smov [#allocation10]  }
  0x37   :  { %409 = vmatprep.subr.bf16.mxu1 %v595_v0  ;;  %425 = vmatprep.mubr.msk.bf16.mxu1 %vm596_vm0, %v595_v0  ;;  %v450_v6 = vld [vmem:[#allocation8 + $0x30] sm:$0xff]   ;;  %v445_v7 = vld [vmem:[#allocation7 + $0x18] sm:$0xff]   ;;  %v451_v8 = vld [vmem:[#allocation8 + $0x28] sm:$0xff]   ;;  %s323_s24 = sshll.u32 %s597_s23, 4  ;;  %s324_s24 = int_to_ptr.vmem [resolvable:$true] %s323_s24 }
  0x38   :  { %390 = vmatpush3.bf16.msra.mxu0 %v441_v1  ;;  %410 = vmatpush3.bf16.msra.mxu1 %v449_v4  ;;  %v446_v9 = vld [vmem:[#allocation7 + $0x10] sm:$0xff]   ;;  %v452_v10 = vld [vmem:[#allocation8 + $0x20] sm:$0xff]   ;;  %v447_v11 = vld [vmem:[#allocation7 + $0x8] sm:$0xff]   ;;  %s537_s25 = scalar_lea.vmem %s324_s24, 256  ;;  %p542_p7 = scmp.lt.s32.totalorder %s324_s24, %s324_s24 }
  0x39   :  { %391 = vmatprep.subr.bf16.mxu0 %v595_v0  ;;  %411 = vmatprep.subr.bf16.mxu1 %v595_v0  ;;  %v81_v12 = vld [vmem:[#allocation5] sm:$0xff]  ;;  %v82_v13 = vld [vmem:[#allocation2] sm:$0xff]  ;;  %v83_v14 = vld [vmem:[#allocation2 + $0x8] sm:$0xff]  ;;  %p538_p6 = scmp.ne.s32.totalorder %s324_s24, %s537_s25  ;;  %p543_p8 = scmp.lt.s32.totalorder %s537_s25, %s537_s25 }
  0x3a   :  { %v453_v15 = vld [vmem:[#allocation8 + $0x18] sm:$0xff]   ;;  %v84_v16 = vadd.f32 %v82_v13, %v81_v12  ;;  %v85_v17 = vadd.f32 %v83_v14, %v81_v12  ;;  %v448_v18 = vld [vmem:[#allocation7] sm:$0xff]   ;;  %v454_v20 = vld [vmem:[#allocation8 + $0x10] sm:$0xff]  }
  0x3b   :  { %v455_v21 = vld [vmem:[#allocation8 + $0x8] sm:$0xff]   ;;  %v456_v22 = vld [vmem:[#allocation8] sm:$0xff]   ;;  %p544_p9 = por %p543_p8, %p542_p7 }
  0x3c   :  { %392 = vmatpush3.bf16.msra.mxu0 %v442_v2  ;;  %412 = vmatpush3.bf16.msra.mxu1 %v450_v6  ;;  %v86_v19 = vpack.c.bf16 %v85_v17, %v84_v16  ;;  %v353_v23 = vld [vmem:[%s675_s3] ss:$0 sm:$0xff] }
  0x3d   :  { %393 = vmatprep.subr.bf16.mxu0 %v595_v0  ;;  %413 = vmatprep.subr.bf16.mxu1 %v595_v0  ;;  %p545_p10 = pnand %p544_p9, %p538_p6 }
  0x40   :  { %394 = vmatpush3.bf16.msra.mxu0 %v443_v3  ;;  %414 = vmatpush3.bf16.msra.mxu1 %v451_v8 }
  0x41   :  { %395 = vmatprep.subr.bf16.mxu0 %v595_v0  ;;  %415 = vmatprep.subr.bf16.mxu1 %v595_v0 }
  0x44   :  { %396 = vmatpush3.bf16.msra.mxu0 %v444_v5  ;;  %416 = vmatpush3.bf16.msra.mxu1 %v452_v10 }
  0x45   :  { %397 = vmatprep.subr.bf16.mxu0 %v595_v0  ;;  %417 = vmatprep.subr.bf16.mxu1 %v595_v0 }
  0x48   :  { %398 = vmatpush3.bf16.msra.mxu0 %v445_v7  ;;  %418 = vmatpush3.bf16.msra.mxu1 %v453_v15 }
  0x49   :  { %399 = vmatprep.subr.bf16.mxu0 %v595_v0  ;;  %419 = vmatprep.subr.bf16.mxu1 %v595_v0 }
  0x4c   :  { %400 = vmatpush3.bf16.msra.mxu0 %v446_v9  ;;  %420 = vmatpush3.bf16.msra.mxu1 %v454_v20 }
  0x4d   :  { %401 = vmatprep.subr.bf16.mxu0 %v595_v0  ;;  %421 = vmatprep.subr.bf16.mxu1 %v595_v0 }
  0x50   :  { %402 = vmatpush3.bf16.msra.mxu0 %v447_v11  ;;  %422 = vmatpush3.bf16.msra.mxu1 %v455_v21 }
  0x51   :  { %403 = vmatprep.subr.bf16.mxu0 %v595_v0  ;;  %423 = vmatprep.subr.bf16.mxu1 %v595_v0 }
  0x54   :  { %404 = vmatpush3.bf16.msra.mxu0 %v448_v18  ;;  %424 = vmatpush3.bf16.msra.mxu1 %v456_v22 }
  0x57   :  { %406 = vmatmul.mubr.bf16.vlgmr.msra.gmra.mxu0 %v86_v19 }
 0x117   :  { %v192_v24 = vpop.f32.mrf.mxu0 }
 0x118   :  { %v193_v25 = vadd.f32 %v353_v23, %v192_v24 }
 0x119   :  { %v407_v26 = vpop.f32.mrf.mxu0 }
 0x11a   :  { %v199_v27 = vmax.f32 %v193_v25, 0.0 }
 0x11b   :  { %v195_v28 = vpop.f32.mrf.mxu0 }
 0x11c   :  { %201 = vst [vmem:[#allocation10] sm:$0xff] %v199_v27  ;;  %v196_v29 = vadd.f32 %v353_v23, %v195_v28 }
 0x11d   :  { %v408_v30 = vpop.f32.mrf.mxu0 }
 0x11e   :  { %v200_v31 = vmax.f32 %v196_v29, 0.0 }
 0x120   :  { %202 = vst [vmem:[#allocation10 + $0x8] sm:$0xff] %v200_v31  ;;  %v203_v32 = vpack.c.bf16 %v200_v31, %v199_v27 }
 0x122   :  { %426 = vmatmul.mubr.bf16.vlgmr.msra.gmra.mxu1 %v203_v32 }
 0x123   :  { %548 = shalt.err (!%p545_p10)
}
 0x124   :  { %329 = dma.vmem_to_hbm [thread:$0]  %s324_s24, 256, %s678_s6, [#allocation4], %s589_s9, %s589_s9, %s590_s10  }
 0x125   :  { %v362_v33 = vld [vmem:[%s677_s5] ss:$0 sm:$0xff]  ;;  %s598_s29 = smov [#allocation11]  }
 0x126   :  { %s335_s30 = sshll.u32 %s598_s29, 4  ;;  %s336_s30 = int_to_ptr.vmem [resolvable:$true] %s335_s30 }
 0x127   :  { %s557_s8 = scalar_lea.vmem %s336_s30, 256  ;;  %p562_p12 = scmp.lt.s32.totalorder %s336_s30, %s336_s30 }
 0x128   :  { %p558_p11 = scmp.ne.s32.totalorder %s336_s30, %s557_s8  ;;  %p563_p13 = scmp.lt.s32.totalorder %s557_s8, %s557_s8 }
 0x12a   :  { %p564_p0 = por %p563_p13, %p562_p12 }
 0x12c   :  { %p565_p1 = pnand %p564_p0, %p558_p11 }
 0x1e2   :  { %v309_v34 = vpop.f32.mrf.mxu1 }
 0x1e3   :  { %v310_v35 = vadd.f32 %v362_v33, %v309_v34 }
 0x1e4   :  { %v427_v36 = vpop.f32.mrf.mxu1 }
 0x1e5   :  { %316 = vst [vmem:[#allocation11] sm:$0xff] %v310_v35 }
 0x1e6   :  { %v312_v37 = vpop.f32.mrf.mxu1 }
 0x1e7   :  { %v313_v38 = vadd.f32 %v362_v33, %v312_v37 }
 0x1e8   :  { %v428_v39 = vpop.f32.mrf.mxu1 }
 0x1e9   :  { %317 = vst [vmem:[#allocation11 + $0x8] sm:$0xff] %v313_v38 }
 0x1ea   :  { %568 = shalt.err (!%p565_p1)
}
 0x1eb   :  { %341 = dma.vmem_to_hbm [thread:$0]  %s336_s30, 256, %s679_s7, [#allocation12], %s589_s9, %s589_s9, %s590_s10  }
 0x1ec   :  { %583 = dma.done.wait [#allocation4], 256  }
 0x1ed   :  { %584 = vsyncadd [#allocation4], 4294967040 }
 0x1ee   :  { %585 = dma.done.wait [#allocation12], 256  }
 0x1ef   :  { %586 = vsyncadd [#allocation12], 4294967040 }
 0x1f0   :  { %348 = vsyncpa [#allocation3], 1 }
 0x1f1   :  { %349 = vsyncpa [#allocation6], 1 }
 0x1f2   :  { %350 = vsyncpa [#allocation9], 1 }
 0x1f3   :  { %351 = vsyncpa [#allocation4], 1 }
 0x1f4   :  { %352 = vsyncpa [#allocation12], 1 }

</bundles_post_ra>
